<compile_context>
chip_gen: v6e
topology: v6e:2x2x1
jax: 0.10.0
libtpu: 0.0.40
codegen_flags: <defaults>
</compile_context>

<pallas_src>
import jax
import jax.numpy as jnp
from jax.experimental import pallas as pl
from jax.experimental.pallas import tpu as pltpu


_SQRT_2_OVER_PI = 0.7978845608028654  # sqrt(2 / pi)


def _round_up(v, m):
    return ((v + m - 1) // m) * m


def _gelu_tanh(h):
    # 0.5 * h * (1 + tanh(sqrt(2/pi) * (h + 0.044715 * h^3))) in f32.
    h2 = h * h
    return 0.5 * h * (1.0 + jnp.tanh(_SQRT_2_OVER_PI * (h + 0.044715 * h * h2)))


def ffn_kernel_resident(x_ref, w1_ref, b1_ref, w2_ref, b2_ref, o_ref):
    # x_ref: (tm, E); w1_ref: (E, H); b1_ref: (1, H) f32; w2_ref: (H, E); b2_ref: (1, E) f32.
    # Full hidden dim resident: single fused pass, no accumulator scratch needed.
    h = jnp.dot(x_ref[...], w1_ref[...],
                preferred_element_type=jnp.float32) + b1_ref[...]
    g = _gelu_tanh(h)
    y = jnp.dot(g.astype(w2_ref.dtype), w2_ref[...],
                preferred_element_type=jnp.float32) + b2_ref[...]
    o_ref[...] = y.astype(o_ref.dtype)


def ffn_kernel_htiled(x_ref, w1_ref, b1_ref, w2_ref, b2_ref, o_ref, acc_ref):
    # Hidden dim tiled along trailing "arbitrary" grid axis; acc_ref is (tm, E) f32.
    h_step = pl.program_id(1)

    h = jnp.dot(x_ref[...], w1_ref[...],
                preferred_element_type=jnp.float32) + b1_ref[...]
    g = _gelu_tanh(h)
    partial = jnp.dot(g.astype(w2_ref.dtype), w2_ref[...],
                      preferred_element_type=jnp.float32)

    # Initialize with the first partial product instead of a separate zeroing pass.
    @pl.when(h_step == 0)
    def _():
        acc_ref[...] = partial

    @pl.when(h_step > 0)
    def _():
        acc_ref[...] += partial

    @pl.when(h_step == pl.num_programs(1) - 1)
    def _():
        o_ref[...] = (acc_ref[...] + b2_ref[...]).astype(o_ref.dtype)


def _vmem_budget_bytes():
    """Physical VMEM capacity minus ~15% headroom (generation-aware)."""
    cap = None
    try:
        info = pltpu.get_tpu_info()
        cap = getattr(info, "vmem_capacity_bytes", None)
    except Exception:
        cap = None
    if not cap:
        cap = 64 * 1024 * 1024  # conservative fallback (v7x per-TC)
    return int(cap * 0.85)


def feed_forward(x, w1, b1, w2, b2, *, tm=None, th=None,
                 compute_dtype=None, vmem_limit_bytes=None):
    """Fused FeedForward. x: (B, S, E); w1: (E, H); b1: (H,); w2: (H, E); b2: (E,).

    Computes y = GELU_tanh(x @ W1 + b1) @ W2 + b2 (PyTorch nn.Linear semantics with
    weights pre-transposed to [in, out]).
    """
    B, S, E = x.shape
    H = w1.shape[1]
    out_dtype = x.dtype

    # bf16 operands (f32 accumulation) is the fast path on v5e/v6e/v7x MXUs and
    # halves weight/activation HBM traffic.
    if compute_dtype is None:
        compute_dtype = jnp.bfloat16 if x.dtype == jnp.float32 else x.dtype
    cb = jnp.dtype(compute_dtype).itemsize
    ob = jnp.dtype(out_dtype).itemsize

    M = B * S
    M8 = _round_up(M, 8)

    # Row tile: big enough to clear the compute-bound intensity threshold when weights
    # must be re-streamed; clamped to the (sublane-rounded) token count.
    if tm is None:
        tm = 1024 if cb <= 2 else 512
    tm = max(8, min(_round_up(tm, 8), M8))
    num_m = pl.cdiv(M, tm)
    # Keep >= 2 row blocks on the "parallel" axis so both v7x TensorCores get work.
    if num_m == 1 and M8 >= 16:
        tm = _round_up((M8 + 1) // 2, 8)
        num_m = pl.cdiv(M, tm)
    M_pad = num_m * tm

    budget = _vmem_budget_bytes()

    def fullh_bytes(tm_):
        return (4 * E * H * cb          # W1 + W2, double-buffered
                + 2 * tm_ * E * cb      # x tiles (double-buffered)
                + 2 * tm_ * E * ob      # out tiles
                + 2 * tm_ * H * 4       # GELU intermediates (f32)
                + 2 * (H + E) * 4)      # biases

    def tiled_bytes(tm_, th_):
        return (4 * 2 * E * th_ * cb    # W1/W2 hidden slices, double-buffered
                + 2 * tm_ * E * cb      # x tiles
                + 2 * tm_ * E * ob      # out tiles
                + tm_ * E * 4           # f32 accumulator scratch
                + 2 * tm_ * th_ * 4     # GELU intermediates (f32)
                + 2 * (th_ + E) * 4)    # biases

    # Hidden tile selection: keep all weights resident if they fit the VMEM budget,
    # otherwise pick the largest lane-aligned divisor of H that fits.
    if th is None:
        if fullh_bytes(tm) <= budget:
            th = H
        else:
            th = None
            for cand in (512, 384, 256, 128):
                if cand < H and H % cand == 0 and tiled_bytes(tm, cand) <= budget:
                    th = cand
                    break
            if th is None:
                th = 128 if (H % 128 == 0 and H > 128) else H
    else:
        th = min(th, H)
        if H % th != 0:
            th = H
    num_h = H // th

    # Prepare operands. Weights are only cast when their dtype mismatches; keep
    # weights in compute_dtype outside the hot path to avoid per-call HBM traffic.
    x2 = x.reshape(M, E)
    if M_pad != M:
        x2 = jnp.pad(x2, ((0, M_pad - M), (0, 0)))
    if x2.dtype != compute_dtype:
        x2 = x2.astype(compute_dtype)
    w1c = w1 if w1.dtype == compute_dtype else w1.astype(compute_dtype)
    w2c = w2 if w2.dtype == compute_dtype else w2.astype(compute_dtype)
    b1_2 = b1.reshape(1, H).astype(jnp.float32)
    b2_2 = b2.reshape(1, E).astype(jnp.float32)

    if vmem_limit_bytes is None:
        foot = fullh_bytes(tm) if num_h == 1 else tiled_bytes(tm, th)
        vmem_limit_bytes = min(max(int(foot * 1.25), 32 * 1024 * 1024), budget)
    vmem_limit_bytes = int(min(vmem_limit_bytes, budget))

    if num_h == 1:
        # Resident-weights path: constant weight block index -> DMA'd once, kept in VMEM.
        out = pl.pallas_call(
            ffn_kernel_resident,
            out_shape=jax.ShapeDtypeStruct((M_pad, E), out_dtype),
            grid_spec=pltpu.PrefetchScalarGridSpec(
                num_scalar_prefetch=0,
                grid=(num_m,),
                in_specs=[
                    pl.BlockSpec((tm, E), lambda i: (i, 0)),   # x tile
                    pl.BlockSpec((E, H), lambda i: (0, 0)),    # full W1 (resident)
                    pl.BlockSpec((1, H), lambda i: (0, 0)),    # b1
                    pl.BlockSpec((H, E), lambda i: (0, 0)),    # full W2 (resident)
                    pl.BlockSpec((1, E), lambda i: (0, 0)),    # b2
                ],
                out_specs=pl.BlockSpec((tm, E), lambda i: (i, 0)),
            ),
            compiler_params=pltpu.CompilerParams(
                dimension_semantics=("parallel",),
                vmem_limit_bytes=vmem_limit_bytes,
            ),
        )(x2, w1c, b1_2, w2c, b2_2)
    else:
        out = pl.pallas_call(
            ffn_kernel_htiled,
            out_shape=jax.ShapeDtypeStruct((M_pad, E), out_dtype),
            grid_spec=pltpu.PrefetchScalarGridSpec(
                num_scalar_prefetch=0,
                grid=(num_m, num_h),                              # hidden axis last
                in_specs=[
                    pl.BlockSpec((tm, E), lambda i, h: (i, 0)),   # x tile
                    pl.BlockSpec((E, th), lambda i, h: (0, h)),   # W1 hidden slice
                    pl.BlockSpec((1, th), lambda i, h: (0, h)),   # b1 hidden slice
                    pl.BlockSpec((th, E), lambda i, h: (h, 0)),   # W2 hidden slice
                    pl.BlockSpec((1, E), lambda i, h: (0, 0)),    # b2
                ],
                out_specs=pl.BlockSpec((tm, E), lambda i, h: (i, 0)),
                scratch_shapes=[pltpu.VMEM((tm, E), jnp.float32)],
            ),
            compiler_params=pltpu.CompilerParams(
                dimension_semantics=("parallel", "arbitrary"),
                vmem_limit_bytes=vmem_limit_bytes,
            ),
        )(x2, w1c, b1_2, w2c, b2_2)

    if M_pad != M:
        out = out[:M]
    return out.reshape(B, S, E)


def feed_forward_ref(x, w1, b1, w2, b2):
    hp = jax.lax.Precision.HIGHEST
    h = jnp.einsum("bse,eh->bsh", x, w1, precision=hp) + b1
    g = 0.5 * h * (1.0 + jnp.tanh(_SQRT_2_OVER_PI * (h + 0.044715 * h ** 3)))
    return jnp.einsum("bsh,he->bse", g, w2, precision=hp) + b2


def _make_inputs(key, B, S, E):
    H = 4 * E
    kx, k1, k2, k3, k4 = jax.random.split(key, 5)
    x = jax.random.normal(kx, (B, S, E), dtype=jnp.float32)
    w1 = jax.random.normal(k1, (E, H), dtype=jnp.float32) * 0.02
    b1 = jax.random.normal(k2, (H,), dtype=jnp.float32) * 0.02
    w2 = jax.random.normal(k3, (H, E), dtype=jnp.float32) * 0.02
    b2 = jax.random.normal(k4, (E,), dtype=jnp.float32) * 0.02
    return x, w1, b1, w2, b2


if __name__ == "__main__":
    key = jax.random.PRNGKey(0)
    k_small, k_med = jax.random.split(key, 2)

    # 1) Toy config from the module spec: emb_dim=32 -> hidden=128; batch=2, seq=8.
    #    Resident-weights path, f32 compute for a tight check.
    B, S, E = 2, 8, 32
    x, w1, b1, w2, b2 = _make_inputs(k_small, B, S, E)
    out = feed_forward(x, w1, b1, w2, b2, compute_dtype=jnp.float32)
    jax.block_until_ready(out)
    ref = feed_forward_ref(x, w1, b1, w2, b2)
    assert out.shape == (B, S, E)
    assert jnp.allclose(out, ref, atol=1e-3, rtol=1e-3), "f32 mismatch (resident path)"

    # 2) Larger config forcing the hidden-tiled kernel (num_h > 1) and token padding
    #    (M = 130 not a multiple of the row tile), still f32 compute.
    B2, S2, E2 = 2, 65, 128
    x2, w12, b12, w22, b22 = _make_inputs(k_med, B2, S2, E2)
    out2 = feed_forward(x2, w12, b12, w22, b22, th=256, compute_dtype=jnp.float32)
    jax.block_until_ready(out2)
    ref2 = feed_forward_ref(x2, w12, b12, w22, b22)
    assert out2.shape == (B2, S2, E2)
    assert jnp.allclose(out2, ref2, atol=1e-3, rtol=1e-3), "f32 mismatch (H-tiled path)"

    # 3) Default path: bf16 operands with f32 accumulation (fast path on v5e/v6e/v7x).
    #    Intentional precision trade vs. the Precision.HIGHEST f32 reference.
    out_bf16 = feed_forward(x2, w12, b12, w22, b22)
    jax.block_until_ready(out_bf16)
    assert jnp.allclose(out_bf16, ref2, atol=5e-2, rtol=1e-1), "bf16 mismatch"

    print("KERNEL_OK")
</pallas_src>

<mosaic_0001>
module attributes {stable_mosaic.version = 11 : i64} {
  func.func @ffn_kernel_resident(%arg0: i32, %arg1: memref<8x32xf32, #tpu.memory_space<vmem>>, %arg2: memref<32x128xf32, #tpu.memory_space<vmem>>, %arg3: memref<1x128xf32, #tpu.memory_space<vmem>>, %arg4: memref<128x32xf32, #tpu.memory_space<vmem>>, %arg5: memref<1x32xf32, #tpu.memory_space<vmem>>, %arg6: memref<8x32xf32, #tpu.memory_space<vmem>>) attributes {dimension_semantics = [#tpu.dimension_semantics<parallel>], iteration_bounds = array<i64: 2>, scalar_prefetch = 0 : i64, scratch_operands = 0 : i64, tpu.core_type = #tpu.core_type<tc>, window_params = [{transform_indices = @transform_0, window_bounds = array<i64: 8, 32>}, {pipeline_mode = #tpu.pipeline_mode<synchronous>, transform_indices = @transform_1, window_bounds = array<i64: 32, 128>}, {pipeline_mode = #tpu.pipeline_mode<synchronous>, transform_indices = @transform_2, window_bounds = array<i64: 1, 128>}, {pipeline_mode = #tpu.pipeline_mode<synchronous>, transform_indices = @transform_3, window_bounds = array<i64: 128, 32>}, {pipeline_mode = #tpu.pipeline_mode<synchronous>, transform_indices = @transform_4, window_bounds = array<i64: 1, 32>}, {transform_indices = @transform_5, window_bounds = array<i64: 8, 32>}]} {
    %c0 = arith.constant 0 : index
    %c0_0 = arith.constant 0 : index
    %0 = vector.load %arg1[%c0, %c0_0] : memref<8x32xf32, #tpu.memory_space<vmem>>, vector<8x32xf32>
    %c0_1 = arith.constant 0 : index
    %c0_2 = arith.constant 0 : index
    %1 = vector.load %arg2[%c0_1, %c0_2] : memref<32x128xf32, #tpu.memory_space<vmem>>, vector<32x128xf32>
    %cst = arith.constant dense<0.000000e+00> : vector<8x128xf32>
    %2 = tpu.matmul %0, %1, %cst {dimension_numbers = #tpu.dot_dimension_numbers<[1], [0], [0], [1], [0, 0, 1, 1], [], []>} : vector<8x32xf32>, vector<32x128xf32>, vector<8x128xf32> -> vector<8x128xf32>
    %c0_3 = arith.constant 0 : index
    %c0_4 = arith.constant 0 : index
    %3 = vector.load %arg3[%c0_3, %c0_4] : memref<1x128xf32, #tpu.memory_space<vmem>>, vector<1x128xf32>
    %4 = vector.broadcast %3 : vector<1x128xf32> to vector<8x128xf32>
    %5 = arith.addf %2, %4 : vector<8x128xf32>
    %6 = arith.mulf %5, %5 : vector<8x128xf32>
    %cst_5 = arith.constant 5.000000e-01 : f32
    %7 = vector.broadcast %cst_5 : f32 to vector<8x128xf32>
    %8 = arith.mulf %7, %5 : vector<8x128xf32>
    %cst_6 = arith.constant 4.471500e-02 : f32
    %9 = vector.broadcast %cst_6 : f32 to vector<8x128xf32>
    %10 = arith.mulf %9, %5 : vector<8x128xf32>
    %11 = arith.mulf %10, %6 : vector<8x128xf32>
    %12 = arith.addf %5, %11 : vector<8x128xf32>
    %cst_7 = arith.constant 0.797884583 : f32
    %13 = vector.broadcast %cst_7 : f32 to vector<8x128xf32>
    %14 = arith.mulf %13, %12 : vector<8x128xf32>
    %15 = math.tanh %14 : vector<8x128xf32>
    %cst_8 = arith.constant 1.000000e+00 : f32
    %16 = vector.broadcast %cst_8 : f32 to vector<8x128xf32>
    %17 = arith.addf %16, %15 : vector<8x128xf32>
    %18 = arith.mulf %8, %17 : vector<8x128xf32>
    %c0_9 = arith.constant 0 : index
    %c0_10 = arith.constant 0 : index
    %19 = vector.load %arg4[%c0_9, %c0_10] : memref<128x32xf32, #tpu.memory_space<vmem>>, vector<128x32xf32>
    %cst_11 = arith.constant dense<0.000000e+00> : vector<8x32xf32>
    %20 = tpu.matmul %18, %19, %cst_11 {dimension_numbers = #tpu.dot_dimension_numbers<[1], [0], [0], [1], [0, 0, 1, 1], [], []>} : vector<8x128xf32>, vector<128x32xf32>, vector<8x32xf32> -> vector<8x32xf32>
    %c0_12 = arith.constant 0 : index
    %c0_13 = arith.constant 0 : index
    %21 = vector.load %arg5[%c0_12, %c0_13] : memref<1x32xf32, #tpu.memory_space<vmem>>, vector<1x32xf32>
    %22 = vector.broadcast %21 : vector<1x32xf32> to vector<8x32xf32>
    %23 = arith.addf %20, %22 : vector<8x32xf32>
    %c0_14 = arith.constant 0 : index
    %c0_15 = arith.constant 0 : index
    %24 = vector.load %arg6[%c0_14, %c0_15] : memref<8x32xf32, #tpu.memory_space<vmem>>, vector<8x32xf32>
    tpu.vector_store %arg6[%c0_14, %c0_15], %23 {strides = array<i32>} : memref<8x32xf32, #tpu.memory_space<vmem>>, vector<8x32xf32>,
    return
  }
  func.func @transform_0(%arg0: i32) -> (i32, i32) {
    %c0_i32 = arith.constant 0 : i32
    %c0_i32_0 = arith.constant 0 : i32
    return %arg0, %c0_i32 : i32, i32
  }
  func.func @transform_1(%arg0: i32) -> (i32, i32) {
    %c0_i32 = arith.constant 0 : i32
    %c0_i32_0 = arith.constant 0 : i32
    %c0_i32_1 = arith.constant 0 : i32
    return %c0_i32, %c0_i32_0 : i32, i32
  }
  func.func @transform_2(%arg0: i32) -> (i32, i32) {
    %c0_i32 = arith.constant 0 : i32
    %c0_i32_0 = arith.constant 0 : i32
    %c0_i32_1 = arith.constant 0 : i32
    return %c0_i32, %c0_i32_0 : i32, i32
  }
  func.func @transform_3(%arg0: i32) -> (i32, i32) {
    %c0_i32 = arith.constant 0 : i32
    %c0_i32_0 = arith.constant 0 : i32
    %c0_i32_1 = arith.constant 0 : i32
    return %c0_i32, %c0_i32_0 : i32, i32
  }
  func.func @transform_4(%arg0: i32) -> (i32, i32) {
    %c0_i32 = arith.constant 0 : i32
    %c0_i32_0 = arith.constant 0 : i32
    %c0_i32_1 = arith.constant 0 : i32
    return %c0_i32, %c0_i32_0 : i32, i32
  }
  func.func @transform_5(%arg0: i32) -> (i32, i32) {
    %c0_i32 = arith.constant 0 : i32
    %c0_i32_0 = arith.constant 0 : i32
    return %arg0, %c0_i32 : i32, i32
  }
}

</mosaic_0001>

<bundles_post_ra>
// kernel: tpu_custom_call.1
= control target key start
LH: loop header
LB: loop body
LE: loop exit
PB: predicated region body
PF: predicated region fallthrough
CT: control target
= control target key end

     0   :  { %10 = vsyncpa [#allocation3], 0  ;;  %s884_s0 = inlined_call_operand.vmem [shape: f32[16,32], index: 0, kind: input, shape index: {}]   ;;  %s885_s1 = inlined_call_operand.vmem [shape: f32[32,128], index: 1, kind: input, shape index: {}]   ;;  %s886_s2 = inlined_call_operand.vmem [shape: f32[1,128], index: 2, kind: input, shape index: {}]   ;;  %s887_s3 = inlined_call_operand.vmem [shape: f32[128,32], index: 3, kind: input, shape index: {}]   ;;  %s888_s4 = inlined_call_operand.vmem [shape: f32[1,32], index: 4, kind: input, shape index: {}]   ;;  %s889_s5 = inlined_call_operand.hbm [shape: f32[16,32], index: 5, kind: output, shape index: {}]  }
   0x1   :  { %12 = vsyncpa [#allocation3 + $0x1], 0  ;;  %s701_s18 = smov 0   ;;  %s703_s19 = smov 0  }
   0x2   :  { %s705_s20 = smov 0   ;;  %s707_s21 = smov 0  }
   0x3 LB: > { %s722_s22 = sadd.s32 4294967295, %s666_s21   ;;  %s482_s23 = sadd.s32 4294967294, %s666_s21   ;;  %s666_s21 = sphi %s707_s21, %s895_s21   ;;  %s662_s20 = sphi %s705_s20, %s894_s20   ;;  %s658_s19 = sphi %s703_s19, %s893_s19   ;;  %s654_s18 = sphi %s701_s18, %s892_s18  }
   0x4   : > { %s726_s24 = sadd.s32 1, %s666_s21   ;;  %s135_s25 = sadd.s32 1, %s662_s20 }
   0x5   : > { %s132_s26 = ssub.s32 %s666_s21, %s726_s24  ;;  %p145_p0 = scmp.ne.s32.totalorder %s662_s20, %s658_s19 }
   0x6   : > { %p133_p1 = scmp.eq.s32.totalorder %s132_s26, 0  ;;  %p146_p2 = scmp.eq.s32.totalorder %s722_s22, 1 }
   0x7   : > { %p151_p3 = scmp.ne.s32.totalorder %s658_s19, %s654_s18  ;;  %p152_p4 = scmp.eq.s32.totalorder %s482_s23, 1 }
   0x8   : > { %s737_s27 = scalar_select %p133_p1, %s662_s20, %s135_s25  }
   0x9   : > { %p739_p5 = por %p146_p2, %p145_p0  ;;  %p743_p6 = por %p152_p4, %p151_p3 }
   0xa   : > { %p485_p7 = scmp.ge.s32.totalorder %s666_s21, 1  ;;  %p189_p8 = scmp.lt.s32.totalorder %s666_s21, 3 }
   0xc   : > { %p190_p9 = pnand %p485_p7, %p189_p8 }
   0xd   : > { %p216_p10 = scmp.lt.s32.totalorder (!%p190_p9), %s722_s22, 1  ;;  %s213_s26 = sand.u32 (!%p190_p9), 1, %s658_s19  }
   0xe   : > { %193 = sbr.rel (%p190_p9) target bundleno = 457 (0x1c9), region = 40  ;;  %s486_s30 = sshll.u32 (!%p190_p9), %s213_s26, 3 }
   0xf   : > { %s492_s8 = sshll.u32 (!%p190_p9), %s722_s22, 7  ;;  %s215_s9 = scalar_lea.vmem (!%p190_p9), [#allocation2], %s486_s30 }
  0x10   : > { %s423_s10 = sshll.u32 (!%p190_p9), %s215_s9, 4  ;;  %s848_s13 = scalar_lea.hbm (!%p190_p9), %s889_s5, %s492_s8  ;;  %s424_s10 = int_to_ptr.vmem [resolvable:$true] %s423_s10 }
  0x11   : > { %s606_s15 = scalar_lea.vmem (!%p190_p9), %s424_s10, 128 }
  0x12   : > { %p607_p11 = scmp.ne.s32.totalorder (!%p190_p9), %s424_s10, %s606_s15 }
  0x13   : > { %v224_v0 = vld [vmem:[%s885_s1 + $0x18] sm:$0xff]  ;;  %v668_v1 = vmov 0.0   ;;  %v223_v2 = vld [vmem:[%s885_s1 + $0x10] sm:$0xff]  ;;  %vm669_vm0 = vmmov 0   ;;  %s217_s11 = scalar_select %p216_p10, %s722_s22, 1  ;;  %v222_v4 = vld [vmem:[%s885_s1 + $0x8] sm:$0xff] }
  0x14   : > { %517 = vmatprep.subr.mxu0 %v668_v1  ;;  %525 = vmatprep.mubr.msk.f32.mxu0 %vm669_vm0, %v668_v1  ;;  %v330_v3 = vld [vmem:[%s887_s3 + $0x78] sm:$0xff]  ;;  %v221_v5 = vld [vmem:[%s885_s1] sm:$0xff]  ;;  %vm232_vm1 = vcmask 261120   ;;  %v329_v7 = vld [vmem:[%s887_s3 + $0x70] sm:$0xff]  ;;  %p608_p12 = pnand %p607_p11, %p739_p5  ;;  %s670_s22 = smov [#allocation2]  }
  0x15   : > { %518 = vmatpush3.msra.mxu0 %v224_v0  ;;  %528 = vmatprep.subr.mxu1 %v668_v1  ;;  %s487_s14 = sshll.u32 %s217_s11, 3  ;;  %v328_v8 = vld [vmem:[%s887_s3 + $0x68] sm:$0xff]  ;;  %v327_v9 = vld [vmem:[%s887_s3 + $0x60] sm:$0xff]  ;;  %v326_v10 = vld [vmem:[%s887_s3 + $0x58] sm:$0xff]  ;;  %s610_s16 = sshll.u32 %s670_s22, 4  ;;  %s611_s16 = int_to_ptr.vmem [resolvable:$false] %s610_s16 }
  0x16   : > { %519 = vmatprep.subr.mxu0 %v668_v1  ;;  %529 = vmatpush3.msra.mxu1 %v330_v3  ;;  %s219_s25 = scalar_lea.vmem %s884_s0, %s487_s14  ;;  %v325_v11 = vld [vmem:[%s887_s3 + $0x50] sm:$0xff]  ;;  %v324_v12 = vld [vmem:[%s887_s3 + $0x48] sm:$0xff]  ;;  %v323_v13 = vld [vmem:[%s887_s3 + $0x40] sm:$0xff]  ;;  %s410_s14 = scalar_lea.sflag [#allocation3], %s213_s26 }
  0x17   : > { %520 = vmatpush3.msra.mxu0 %v223_v2  ;;  %530 = vmatprep.subr.mxu1 %v668_v1  ;;  %v220_v6 = vld [vmem:[%s219_s25] sm:$0xff]  ;;  %v322_v14 = vld [vmem:[%s887_s3 + $0x38] sm:$0xff]  ;;  %v321_v15 = vld [vmem:[%s887_s3 + $0x30] sm:$0xff]  ;;  %p609_p13 = pneg %p608_p12  ;;  %s612_s17 = scalar_lea.vmem %s611_s16, 256 }
  0x18   : > { %521 = vmatprep.subr.mxu0 %v668_v1  ;;  %560 = vmatprep.mubr.msk.f32.mxu1 %vm669_vm0, %v668_v1  ;;  %v320_v16 = vld [vmem:[%s887_s3 + $0x28] sm:$0xff]  ;;  %v319_v17 = vld [vmem:[%s887_s3 + $0x20] sm:$0xff]  ;;  %v318_v18 = vld [vmem:[%s887_s3 + $0x18] sm:$0xff]  ;;  %p613_p0 = scmp.lt.s32.totalorder %s424_s10, %s611_s16  ;;  %p614_p1 = scmp.lt.s32.totalorder %s612_s17, %s606_s15 }
  0x19   : > { %522 = vmatpush3.msra.mxu0 %v222_v4  ;;  %531 = vmatpush3.msra.mxu1 %v329_v7  ;;  %v317_v19 = vld [vmem:[%s887_s3 + $0x10] sm:$0xff]  ;;  %v316_v20 = vld [vmem:[%s887_s3 + $0x8] sm:$0xff]  ;;  %v315_v21 = vld [vmem:[%s887_s3] sm:$0xff] }
  0x1a   : > { %523 = vmatprep.subr.mxu0 %v668_v1  ;;  %532 = vmatprep.subr.mxu1 %v668_v1  ;;  %v488_v22 = vld [vmem:[%s886_s2] ss:$0 sm:$0xff]  ;;  %p615_p2 = por %p614_p1, %p613_p0 }
  0x1b   : > { %524 = vmatpush3.msra.mxu0 %v221_v5  ;;  %533 = vmatpush3.msra.mxu1 %v328_v8  ;;  %v490_v35 = vld [vmem:[%s888_s4] ss:$0 sm:$0xff] }
  0x1c   : > { %526 = vmatmul.mubr.msk.f32.vlgmr.msra.gmra.mxu0 %vm232_vm1, %v220_v6  ;;  %534 = vmatprep.subr.mxu1 %v668_v1  ;;  %p616_p3 = pnand %p615_p2, %p609_p13 }
  0x1d   : > { %535 = vmatpush3.msra.mxu1 %v327_v9 }
  0x1e   : > { %536 = vmatprep.subr.mxu1 %v668_v1 }
  0x1f   : > { %537 = vmatpush3.msra.mxu1 %v326_v10 }
  0x20   : > { %538 = vmatprep.subr.mxu1 %v668_v1 }
  0x21   : > { %539 = vmatpush3.msra.mxu1 %v325_v11 }
  0x22   : > { %540 = vmatprep.subr.mxu1 %v668_v1 }
  0x23   : > { %541 = vmatpush3.msra.mxu1 %v324_v12 }
  0x24   : > { %542 = vmatprep.subr.mxu1 %v668_v1 }
  0x25   : > { %543 = vmatpush3.msra.mxu1 %v323_v13 }
  0x26   : > { %544 = vmatprep.subr.mxu1 %v668_v1 }
  0x27   : > { %545 = vmatpush3.msra.mxu1 %v322_v14 }
  0x28   : > { %546 = vmatprep.subr.mxu1 %v668_v1 }
  0x29   : > { %547 = vmatpush3.msra.mxu1 %v321_v15 }
  0x2a   : > { %548 = vmatprep.subr.mxu1 %v668_v1 }
  0x2b   : > { %549 = vmatpush3.msra.mxu1 %v320_v16 }
  0x2c   : > { %550 = vmatprep.subr.mxu1 %v668_v1 }
  0x2d   : > { %551 = vmatpush3.msra.mxu1 %v319_v17 }
  0x2e   : > { %552 = vmatprep.subr.mxu1 %v668_v1 }
  0x2f   : > { %553 = vmatpush3.msra.mxu1 %v318_v18 }
  0x30   : > { %554 = vmatprep.subr.mxu1 %v668_v1 }
  0x31   : > { %555 = vmatpush3.msra.mxu1 %v317_v19 }
  0x32   : > { %556 = vmatprep.subr.mxu1 %v668_v1 }
  0x33   : > { %557 = vmatpush3.msra.mxu1 %v316_v20 }
  0x34   : > { %558 = vmatprep.subr.mxu1 %v668_v1 }
  0x35   : > { %559 = vmatpush3.msra.mxu1 %v315_v21 }
  0xdc   : > { %v302_v23 = vpop.f32.mrf.mxu0 }
  0xdd   : > { %v303_v24 = vadd.f32 %v488_v22, %v302_v23 }
  0xde   : > { %v527_v25 = vpop.f32.mrf.mxu0 }
  0xdf   : > { %v306_v26 = vmul.f32 %v303_v24, %v303_v24  ;;  %v308_v27 = vmul.f32 0.044715, %v303_v24  ;;  %v307_v32 = vmul.f32 0.5, %v303_v24 }
  0xe1   : > { %v309_v28 = vmul.f32 %v308_v27, %v306_v26 }
  0xe3   : > { %v310_v29 = vadd.f32 %v309_v28, %v303_v24 }
  0xe5   : > { %v311_v30 = vmul.f32 0.7978846, %v310_v29 }
  0xe7   : > { %604 = vtanh.f32 %v311_v30 }
  0xf4   : > { %v605_v31 = vpop.eup %604 }
  0xf5   : > { %v313_v33 = vadd.f32 1.0, %v605_v31 }
  0xf7   : > { %v314_v34 = vmul.f32 %v313_v33, %v307_v32 }
  0xf9   : > { %561 = vmatmul.mubr.f32.vlgmr.msra.gmra.mxu1 %v314_v34 }
 0x1b9   : > { %v404_v36 = vpop.f32.mrf.mxu1 }
 0x1ba   : > { %v405_v37 = vadd.f32 %v490_v35, %v404_v36 }
 0x1bb   : > { %v562_v38 = vpop.f32.mrf.mxu1 }
 0x1bc   : > { %408 = vst.msk [vmem:[%s215_s9] sm:$0xff] %vm232_vm1, %v405_v37 }
 0x1bd   : > { %619 = shalt.err (!%p616_p3)
}
 0x1be   : > { %s620_s23 = scalar_lea.hbm %s848_s13, 128  ;;  %s624_s30 = scalar_lea.hbm %s889_s5, 256 }
 0x1bf   : > { %p621_p4 = scmp.ne.s32.totalorder %s848_s13, %s620_s23  ;;  %p625_p9 = scmp.lt.s32.totalorder %s848_s13, %s889_s5 }
 0x1c0   : > { %p626_p10 = scmp.lt.s32.totalorder %s624_s30, %s620_s23 }
 0x1c1   : > { %p622_p7 = pnand %p621_p4, %p739_p5 }
 0x1c2   : > { %p627_p11 = por %p626_p10, %p625_p9 }
 0x1c3   : > { %p623_p8 = pneg %p622_p7 }
 0x1c5   : > { %p628_p12 = pnand %p627_p11, %p623_p8 }
 0x1c7   : > { %631 = shalt.err (!%p628_p12)
}
 0x1c8   : > { %563 = dma.vmem_to_hbm [thread:$0]  (%p739_p5), %s424_s10, 128, %s848_s13, %s410_s14  }
 0x1c9 PF: > { %p569_p13 = scmp.ge.s32.totalorder %s666_s21, 2  ;;  %s435_s8 = sand.u32 1, %s654_s18  }
 0x1ca   : > { %s436_s9 = scalar_lea.sflag [#allocation3], %s435_s8 }
 0x1cb   : > { %p566_p0 = pnand %p569_p13, %p743_p6 }
 0x1cd   : > { %p567_p1 = pneg %p566_p0 }
 0x1cf   : > { %649 = dma.done.wait (%p567_p1), %s436_s9, 128  }
 0x1d0   : > { %651 = vsyncadd (%p567_p1), %s436_s9, 4294967168  ;;  %p15_p2 = scmp.ge.s32.totalorder %s726_s24, 4   ;;  %s892_s18 = smov %s658_s19 }
 0x1d1   : > { %s893_s19 = smov %s662_s20  ;;  %s894_s20 = smov %s737_s27 }
 0x1d2   : > { %s895_s21 = smov %s726_s24  ;;  %17 = sbr.rel (!%p15_p2) target bundleno = 3 (0x3), region = 75 }
 0x1d7   :  { %441 = vsyncpa [#allocation3], 1 }
 0x1d8   :  { %443 = vsyncpa [#allocation3 + $0x1], 1 }

</bundles_post_ra>
